<compile_context>
chip_gen: v5e
topology: v5e:2x2
jax: 0.10.0
libtpu: 0.0.40
codegen_flags: <defaults>
</compile_context>

<pallas_src>
import jax
import jax.numpy as jnp
from jax.experimental import pallas as pl
from jax.experimental.pallas import tpu as pltpu

_LANES = 512                       # lane-dense last dim (multiple of 128)
_TARGET_BLOCK_BYTES = 2 * 1024 * 1024   # ~2 MiB per block; 2(dbuf) x 2(in+out)
                                        # x 2 MiB = 8 MiB << 32 MiB scoped VMEM


def _identity_copy_kernel(x_ref, o_ref):
    # Pure pass-through: copy the current VMEM tile to the output tile.
    o_ref[...] = x_ref[...]


def _choose_tiling(total_elems, itemsize):
    """Pick (rows, block_rows, padded_total) for a lane-dense (rows, 512) view."""
    rows = pl.cdiv(total_elems, _LANES)
    # Rows per block targeting ~2 MiB, rounded down to a multiple of 8 (sublane).
    block_rows = max(8, _TARGET_BLOCK_BYTES // (_LANES * itemsize))
    block_rows = (block_rows // 8) * 8
    if rows <= block_rows:
        # Single block equal to the full array dims (always a legal block shape).
        block_rows = rows
    else:
        # Pad rows up so the grid divides evenly (no silently-dropped tail).
        rows = pl.cdiv(rows, block_rows) * block_rows
    return rows, block_rows, rows * _LANES


def llayer_forward(x, *, c=None, dw_expand=2):
    """Identity forward of Llayer, implemented as a Pallas TPU kernel.

    Args:
      x: array of shape (N, C, H, W), any dtype.
      c, dw_expand: unused (the reference module stores no parameters).
    Returns:
      Array equal to x (same shape, same dtype).
    """
    # TODO(synk): a production caller should simply `return x` — the Pallas
    # kernel below exists only to demonstrate the pass-through as a kernel.
    orig_shape = x.shape
    total = x.size
    itemsize = jnp.dtype(x.dtype).itemsize

    rows, block_rows, padded_total = _choose_tiling(total, itemsize)

    flat = x.reshape(-1)
    pad = padded_total - total
    if pad:
        flat = jnp.pad(flat, (0, pad))
    x2d = flat.reshape(rows, _LANES)

    grid = (rows // block_rows,)

    out2d = pl.pallas_call(
        _identity_copy_kernel,
        out_shape=jax.ShapeDtypeStruct((rows, _LANES), x.dtype),
        grid_spec=pltpu.PrefetchScalarGridSpec(
            num_scalar_prefetch=0,
            grid=grid,
            in_specs=[pl.BlockSpec((block_rows, _LANES), lambda i: (i, 0))],
            out_specs=pl.BlockSpec((block_rows, _LANES), lambda i: (i, 0)),
        ),
        compiler_params=pltpu.CompilerParams(
            dimension_semantics=("parallel",),
        ),
        # Alias input buffer 0 to output buffer 0: no fresh HBM output
        # allocation is needed for the identity copy.
        input_output_aliases={0: 0},
    )(x2d)

    out_flat = out2d.reshape(-1)
    if pad:
        out_flat = out_flat[:total]
    return out_flat.reshape(orig_shape)


if __name__ == "__main__":
    key = jax.random.PRNGKey(0)
    # Small NCHW input consistent with an image-style module: batch=2,
    # channels=4, spatial=16x16.
    x = jax.random.normal(key, (2, 4, 16, 16), dtype=jnp.float32)

    y = llayer_forward(x, c=4, dw_expand=2)
    y = jax.block_until_ready(y)

    # Verify identity semantics exactly.
    assert y.shape == x.shape and y.dtype == x.dtype
    assert bool(jnp.all(y == x))

    print("KERNEL_OK")
</pallas_src>

<mosaic_0001>
module attributes {stable_mosaic.version = 11 : i64} {
  func.func @_identity_copy_kernel(%arg0: i32, %arg1: memref<4x512xf32, #tpu.memory_space<vmem>>, %arg2: memref<4x512xf32, #tpu.memory_space<vmem>>) attributes {dimension_semantics = [#tpu.dimension_semantics<parallel>], iteration_bounds = array<i64: 1>, scalar_prefetch = 0 : i64, scratch_operands = 0 : i64, tpu.core_type = #tpu.core_type<tc>, window_params = [{transform_indices = @transform_0, window_bounds = array<i64: 4, 512>}, {transform_indices = @transform_1, window_bounds = array<i64: 4, 512>}]} {
    %c0 = arith.constant 0 : index
    %c0_0 = arith.constant 0 : index
    %0 = vector.load %arg1[%c0, %c0_0] : memref<4x512xf32, #tpu.memory_space<vmem>>, vector<4x512xf32>
    %c0_1 = arith.constant 0 : index
    %c0_2 = arith.constant 0 : index
    %1 = vector.load %arg2[%c0_1, %c0_2] : memref<4x512xf32, #tpu.memory_space<vmem>>, vector<4x512xf32>
    tpu.vector_store %arg2[%c0_1, %c0_2], %0 {strides = array<i32>} : memref<4x512xf32, #tpu.memory_space<vmem>>, vector<4x512xf32>,
    return
  }
  func.func @transform_0(%arg0: i32) -> (i32, i32) {
    %c0_i32 = arith.constant 0 : i32
    %c0_i32_0 = arith.constant 0 : i32
    return %arg0, %c0_i32 : i32, i32
  }
  func.func @transform_1(%arg0: i32) -> (i32, i32) {
    %c0_i32 = arith.constant 0 : i32
    %c0_i32_0 = arith.constant 0 : i32
    return %arg0, %c0_i32 : i32, i32
  }
}

</mosaic_0001>

<bundles_post_ra>
// kernel: tpu_custom_call.1
= control target key start
LH: loop header
LB: loop body
LE: loop exit
PB: predicated region body
PF: predicated region fallthrough
CT: control target
= control target key end

     0   :  { %6 = vsyncpa [#allocation3], 0  ;;  %s116_s0 = inlined_call_operand.hbm [shape: f32[4,512], index: 0, kind: input, shape index: {}, may-alias: {0,1}]   ;;  %s117_s1 = inlined_call_operand.hbm [shape: f32[4,512], index: 1, kind: output, shape index: {}, may-alias: {0,1}]  }
   0x1   :  { %7 = vsyncpa [#allocation4], 0  ;;  %s13_s8 = sshll.u32 %s116_s0, 4  ;;  %s98_s9 = smov [#allocation2]   ;;  %s14_s8 = int_to_ptr.hbm [resolvable:$true] %s13_s8 }
   0x2   :  { %s15_s10 = sshll.u32 %s98_s9, 4  ;;  %s16_s10 = int_to_ptr.vmem [resolvable:$true] %s15_s10 }
   0x3   :  { %18 = dma.hbm_to_vmem [thread:$0]  %s14_s8, 256, %s16_s10, [#allocation3]  }
   0x4   :  { %94 = dma.done.wait [#allocation3], 256  }
   0x5   :  { %95 = vsyncadd [#allocation3], 4294967040  ;;  %s99_s11 = smov [#allocation5]   ;;  %s34_s15 = sshll.u32 %s117_s1, 4  ;;  %v23_v0 = vld [vmem:[#allocation2] sm:$0xff]  ;;  %v24_v1 = vld [vmem:[#allocation2 + $0x8] sm:$0xff]  ;;  %s35_s15 = int_to_ptr.hbm [resolvable:$true] %s34_s15 }
   0x6   :  { %s32_s12 = sshll.u32 %s99_s11, 4  ;;  %25 = vst [vmem:[#allocation5] sm:$0xff] %v23_v0  ;;  %s33_s12 = int_to_ptr.vmem [resolvable:$true] %s32_s12 }
   0x7   :  { %26 = vst [vmem:[#allocation5 + $0x8] sm:$0xff] %v24_v1 }
   0x8   :  { %37 = dma.vmem_to_hbm [thread:$0]  %s33_s12, 256, %s35_s15, [#allocation4]  }
   0x9   :  { %96 = dma.done.wait [#allocation4], 256  }
   0xa   :  { %97 = vsyncadd [#allocation4], 4294967040 }
   0xb   :  { %42 = vsyncpa [#allocation3], 1 }
   0xc   :  { %43 = vsyncpa [#allocation4], 1 }

</bundles_post_ra>
